<compile_context>
chip_gen: v5e
topology: v5e:2x2
jax: 0.10.0
libtpu: 0.0.40
codegen_flags: <defaults>
</compile_context>

<pallas_src>
import functools

import jax
import jax.numpy as jnp
from jax.experimental import pallas as pl
from jax.experimental.pallas import tpu as pltpu

SMOOTH = 0.0001
_LANES = 128
_SUBLANES = 8


def _round_up(x, m):
    return ((x + m - 1) // m) * m


def _dice_stats_kernel(logit_ref, target_ref, out_ref):
    """Accumulate per-class dice statistics for one (batch, row-tile) grid step.

    Refs:
      logit_ref:  (1, C, TR, 128)  input dtype (f32/bf16) logits tile
      target_ref: (1, TR, 128)     int32 labels; spatial padding holds C
      out_ref:    (1, 5, C, 128)   f32 per-batch accumulator, rows:
         0: sum p_i * 1[t == i]          (diagonal intersection)
         1: sum p_i * 1[t == prevc(i)]   (cross term with "previous" class)
         2: sum p_i * 1[t == nextc(i)]   (cross term with "next" class)
         3: sum p_i                       (probability mass, valid pixels only)
         4: sum 1[t == i]                 (target mass)
    """
    t_idx = pl.program_id(1)
    C = logit_ref.shape[1]

    @pl.when(t_idx == 0)
    def _init():
        out_ref[...] = jnp.zeros_like(out_ref)

    x = logit_ref[0].astype(jnp.float32)                 # (C, TR, 128)
    # Numerically-stable softmax over the class axis. C is the leading
    # (non-minor) dim, so max/sum over it are pure elementwise VPU work.
    m = jnp.max(x, axis=0, keepdims=True)
    e = jnp.exp(x - m)
    inv = 1.0 / jnp.sum(e, axis=0, keepdims=True)        # one divide per pixel
    probs = e * inv

    t = target_ref[0]                                    # (TR, 128) int32
    valid = (t < C).astype(jnp.float32)                  # mask spatial padding
    pm = probs * valid[None]                             # padded pixels drop out

    cls = jax.lax.broadcasted_iota(jnp.int32, (C,) + t.shape, 0)
    one_hot = (cls == t[None]).astype(jnp.float32)       # (C, TR, 128)

    # Cyclic neighbour maps over classes {1..C-1}; class 0 / padding -> -1.
    #   nextc(c) = c+1 (1<=c<=C-2), 1 (c==C-1);  prevc(c) = c-1 (2<=c<=C-1), C-1 (c==1)
    t_next = jnp.where((t >= 1) & (t <= C - 2), t + 1,
                       jnp.where(t == C - 1, 1, -1))
    t_prev = jnp.where((t >= 2) & (t <= C - 1), t - 1,
                       jnp.where(t == 1, C - 1, -1))
    # row i fires where t == prevc(i)  <=>  nextc(t) == i   (and vice versa)
    prev_hot = (cls == t_next[None]).astype(jnp.float32)
    next_hot = (cls == t_prev[None]).astype(jnp.float32)

    # Reduce over the sublane (row) axis only -> keep the 128-lane axis;
    # the final cross-lane reduction happens once per batch element outside.
    out_ref[0, 0] += jnp.sum(pm * one_hot, axis=1)
    out_ref[0, 1] += jnp.sum(pm * prev_hot, axis=1)
    out_ref[0, 2] += jnp.sum(pm * next_hot, axis=1)
    out_ref[0, 3] += jnp.sum(pm, axis=1)
    out_ref[0, 4] += jnp.sum(one_hot, axis=1)


@functools.partial(jax.jit, static_argnames=("num_classes",))
def weight_multiclass_dice_loss(logit, target, num_classes, weights=None):
    """Pallas implementation of WeightMulticlassDiceLoss.forward.

    Args:
      logit:   (N, C, H, W) float (f32 or bf16) raw scores.
      target:  (N, H, W)    integer class ids in [0, C).
      num_classes: C (static). Must be >= 3 (required by the PyTorch module).
      weights: optional (N,) per-batch weights (defaults to ones, like torch).
    Returns:
      scalar float32 loss.
    """
    N, C, H, W = logit.shape
    assert C == num_classes and C >= 3
    assert target.shape == (N, H, W)
    if weights is None:
        weights = jnp.ones((N,), jnp.float32)
    w = weights.astype(jnp.float32).reshape(N)

    HW = H * W
    rows = -(-HW // _LANES)                              # ceil(HW / 128)
    # Row-tile: ~1 MiB of f32 logits per block, multiple of 8 sublanes.
    max_tr = max(_SUBLANES,
                 ((1 << 20) // (C * _LANES * 4)) // _SUBLANES * _SUBLANES)
    tr = min(_round_up(rows, _SUBLANES), max_tr)
    rows_p = _round_up(rows, tr)
    hw_p = rows_p * _LANES
    num_tiles = rows_p // tr

    logit_r = logit.reshape(N, C, HW)                    # keep native dtype
    target_r = target.reshape(N, HW).astype(jnp.int32)
    if hw_p != HW:
        logit_r = jnp.pad(logit_r, ((0, 0), (0, 0), (0, hw_p - HW)))
        # pad labels with C: matches no class and is masked out in-kernel
        target_r = jnp.pad(target_r, ((0, 0), (0, hw_p - HW)), constant_values=C)
    logit_r = logit_r.reshape(N, C, rows_p, _LANES)
    target_r = target_r.reshape(N, rows_p, _LANES)

    stats = pl.pallas_call(
        _dice_stats_kernel,
        out_shape=jax.ShapeDtypeStruct((N, 5, C, _LANES), jnp.float32),
        grid=(N, num_tiles),
        in_specs=[
            pl.BlockSpec((1, C, tr, _LANES), lambda n, t: (n, 0, t, 0)),
            pl.BlockSpec((1, tr, _LANES), lambda n, t: (n, t, 0)),
        ],
        out_specs=pl.BlockSpec((1, 5, C, _LANES), lambda n, t: (n, 0, 0, 0)),
        compiler_params=pltpu.CompilerParams(
            dimension_semantics=("parallel", "arbitrary"),
            vmem_limit_bytes=32 * 1024 * 1024,
        ),
    )(logit_r, target_r)

    # Final cross-lane reduction + O(N*C) dice combination in plain JAX.
    stats = jnp.sum(stats, axis=-1)                      # (N, 5, C)
    inter_d = stats[:, 0]
    inter_p = stats[:, 1]
    inter_n = stats[:, 2]
    psum = stats[:, 3]
    tsum = stats[:, 4]

    def dice_mean(inter, p, tj):                         # (N, C) each -> (C,)
        num = 2.0 * inter * w[:, None] + SMOOTH
        den = (p + tj) * w[:, None] + SMOOTH
        return jnp.mean(num / den, axis=0)               # mean over batch

    idx = jnp.arange(C)
    prev_idx = jnp.where(idx == 1, C - 1, idx - 1)       # only used for i >= 1
    next_idx = jnp.where(idx == C - 1, 1, idx + 1)

    d_diag = dice_mean(inter_d, psum, tsum)              # D(i, i)
    d_prev = dice_mean(inter_p, psum, tsum[:, prev_idx])  # D(i, prevc(i))
    d_next = dice_mean(inter_n, psum, tsum[:, next_idx])  # D(i, nextc(i))

    loss = 2.0 * (1.0 - d_diag[0])
    loss = loss + jnp.sum((1.0 - d_diag[1:]) - d_prev[1:] - d_next[1:])
    return loss


# ----------------------------------------------------------------------------
# Plain-JAX reference mirroring the PyTorch module (for the self-test).
# ----------------------------------------------------------------------------
def _weight_dice(inp, tgt, w):
    n = inp.shape[0]
    inp_f = inp.reshape(n, -1)
    tgt_f = tgt.reshape(n, -1)
    wv = w.reshape(n, 1)
    inter = (inp_f * tgt_f * wv).sum(axis=1)
    dice = (2.0 * inter + SMOOTH) / ((inp_f * wv).sum(axis=1) +
                                     (tgt_f * wv).sum(axis=1) + SMOOTH)
    return 1.0 - dice.sum() / n


def _reference_loss(logit, target, num_classes, weights=None):
    C = num_classes
    N = logit.shape[0]
    if weights is None:
        weights = jnp.ones((N,), jnp.float32)
    probs = jax.nn.softmax(logit.astype(jnp.float32), axis=1)
    onehot = jax.nn.one_hot(target, C, dtype=jnp.float32)       # (N,H,W,C)
    onehot = jnp.transpose(onehot, (0, 3, 1, 2))                 # (N,C,H,W)
    total = 0.0
    for i in range(C):
        if i == 0:
            d = _weight_dice(probs[:, i], onehot[:, i], weights) * 2
        elif i == 1:
            d = _weight_dice(probs[:, i], onehot[:, i], weights)
            d2 = 1 - _weight_dice(probs[:, i], onehot[:, C - 1], weights)
            d3 = 1 - _weight_dice(probs[:, i], onehot[:, i + 1], weights)
            d = d - d2 - d3
        elif i == C - 1:
            d = _weight_dice(probs[:, i], onehot[:, i], weights)
            d2 = 1 - _weight_dice(probs[:, i], onehot[:, i - 1], weights)
            d3 = 1 - _weight_dice(probs[:, i], onehot[:, 1], weights)
            d = d - d2 - d3
        else:
            d = _weight_dice(probs[:, i], onehot[:, i], weights)
            d2 = 1 - _weight_dice(probs[:, i], onehot[:, i - 1], weights)
            d3 = 1 - _weight_dice(probs[:, i], onehot[:, i + 1], weights)
            d = d - d2 - d3
        total = total + d
    return total


if __name__ == "__main__":
    key = jax.random.PRNGKey(0)
    k1, k2, k3 = jax.random.split(key, 3)

    N, C, H, W = 2, 4, 16, 16
    logit = jax.random.normal(k1, (N, C, H, W), dtype=jnp.float32)
    target = jax.random.randint(k2, (N, H, W), 0, C, dtype=jnp.int32)
    wts = jax.random.uniform(k3, (N,), dtype=jnp.float32, minval=0.5, maxval=1.5)

    # default (ones) weights, like the PyTorch module
    loss = jax.block_until_ready(
        weight_multiclass_dice_loss(logit, target, num_classes=C))
    ref = jax.block_until_ready(_reference_loss(logit, target, C))
    assert jnp.allclose(loss, ref, atol=1e-4, rtol=1e-4), (loss, ref)

    # explicit per-batch weights
    loss_w = jax.block_until_ready(
        weight_multiclass_dice_loss(logit, target, num_classes=C, weights=wts))
    ref_w = jax.block_until_ready(_reference_loss(logit, target, C, weights=wts))
    assert jnp.allclose(loss_w, ref_w, atol=1e-4, rtol=1e-4), (loss_w, ref_w)

    print("KERNEL_OK")
</pallas_src>

<mosaic_0001>
module attributes {stable_mosaic.version = 11 : i64} {
  func.func @_dice_stats_kernel(%arg0: i32, %arg1: i32, %arg2: memref<1x4x8x128xf32, #tpu.memory_space<vmem>>, %arg3: memref<1x8x128xi32, #tpu.memory_space<vmem>>, %arg4: memref<1x5x4x128xf32, #tpu.memory_space<vmem>>) attributes {dimension_semantics = [#tpu.dimension_semantics<parallel>, #tpu.dimension_semantics<arbitrary>], iteration_bounds = array<i64: 2, 1>, scalar_prefetch = 0 : i64, scratch_operands = 0 : i64, tpu.core_type = #tpu.core_type<tc>, window_params = [{transform_indices = @transform_0, window_bounds = array<i64: 1, 4, 8, 128>}, {transform_indices = @transform_1, window_bounds = array<i64: 1, 8, 128>}, {transform_indices = @transform_2, window_bounds = array<i64: 1, 5, 4, 128>}]} {
    %c0_i32 = arith.constant 0 : i32
    %0 = arith.cmpi eq, %arg1, %c0_i32 : i32
    %1 = arith.extui %0 : i1 to i32
    %c0_i32_0 = arith.constant 0 : i32
    %2 = arith.cmpi ne, %1, %c0_i32_0 : i32
    scf.if %2 {
      %cst_58 = arith.constant 0.000000e+00 : f32
      %105 = vector.broadcast %cst_58 : f32 to vector<1x5x4x128xf32>
      %c0_59 = arith.constant 0 : index
      %c0_60 = arith.constant 0 : index
      %c0_61 = arith.constant 0 : index
      %c0_62 = arith.constant 0 : index
      %106 = vector.load %arg4[%c0_59, %c0_60, %c0_61, %c0_62] : memref<1x5x4x128xf32, #tpu.memory_space<vmem>>, vector<1x5x4x128xf32>
      tpu.vector_store %arg4[%c0_59, %c0_60, %c0_61, %c0_62], %105 {strides = array<i32>} : memref<1x5x4x128xf32, #tpu.memory_space<vmem>>, vector<1x5x4x128xf32>,
    } else {
    }
    %c0 = arith.constant 0 : index
    %c0_1 = arith.constant 0 : index
    %c0_2 = arith.constant 0 : index
    %c0_3 = arith.constant 0 : index
    %3 = vector.load %arg2[%c0, %c0_1, %c0_2, %c0_3] : memref<1x4x8x128xf32, #tpu.memory_space<vmem>>, vector<1x4x8x128xf32>
    %4 = vector.shape_cast %3 : vector<1x4x8x128xf32> to vector<4x8x128xf32>
    %cst = arith.constant dense<0xFF800000> : vector<8x128xf32>
    %5 = vector.multi_reduction <maximumf>, %4, %cst [0] : vector<4x8x128xf32> to vector<8x128xf32>
    %6 = vector.shape_cast %5 : vector<8x128xf32> to vector<1x8x128xf32>
    %7 = vector.broadcast %6 : vector<1x8x128xf32> to vector<4x8x128xf32>
    %8 = arith.subf %4, %7 : vector<4x8x128xf32>
    %9 = math.exp %8 : vector<4x8x128xf32>
    %cst_4 = arith.constant dense<0.000000e+00> : vector<8x128xf32>
    %10 = vector.multi_reduction <add>, %9, %cst_4 [0] : vector<4x8x128xf32> to vector<8x128xf32>
    %11 = vector.shape_cast %10 : vector<8x128xf32> to vector<1x8x128xf32>
    %cst_5 = arith.constant 1.000000e+00 : f32
    %12 = vector.broadcast %cst_5 : f32 to vector<1x8x128xf32>
    %13 = arith.divf %12, %11 : vector<1x8x128xf32>
    %14 = vector.broadcast %13 : vector<1x8x128xf32> to vector<4x8x128xf32>
    %15 = arith.mulf %9, %14 : vector<4x8x128xf32>
    %c0_6 = arith.constant 0 : index
    %c0_7 = arith.constant 0 : index
    %c0_8 = arith.constant 0 : index
    %16 = vector.load %arg3[%c0_6, %c0_7, %c0_8] : memref<1x8x128xi32, #tpu.memory_space<vmem>>, vector<1x8x128xi32>
    %17 = vector.shape_cast %16 : vector<1x8x128xi32> to vector<8x128xi32>
    %c4_i32 = arith.constant 4 : i32
    %18 = vector.broadcast %c4_i32 : i32 to vector<8x128xi32>
    %19 = arith.cmpi slt, %17, %18 : vector<8x128xi32>
    %20 = arith.extui %19 : vector<8x128xi1> to vector<8x128xi32>
    %21 = arith.sitofp %20 : vector<8x128xi32> to vector<8x128xf32>
    %22 = vector.shape_cast %21 : vector<8x128xf32> to vector<1x8x128xf32>
    %23 = vector.broadcast %22 : vector<1x8x128xf32> to vector<4x8x128xf32>
    %24 = arith.mulf %15, %23 : vector<4x8x128xf32>
    %25 = tpu.iota {dimensions = array<i32: 0>} : vector<4x8x128xi32>
    %26 = vector.shape_cast %17 : vector<8x128xi32> to vector<1x8x128xi32>
    %27 = vector.broadcast %26 : vector<1x8x128xi32> to vector<4x8x128xi32>
    %28 = arith.cmpi eq, %25, %27 : vector<4x8x128xi32>
    %29 = arith.extui %28 : vector<4x8x128xi1> to vector<4x8x128xi32>
    %30 = arith.sitofp %29 : vector<4x8x128xi32> to vector<4x8x128xf32>
    %c1_i32 = arith.constant 1 : i32
    %31 = vector.broadcast %c1_i32 : i32 to vector<8x128xi32>
    %32 = arith.cmpi sge, %17, %31 : vector<8x128xi32>
    %c2_i32 = arith.constant 2 : i32
    %33 = vector.broadcast %c2_i32 : i32 to vector<8x128xi32>
    %34 = arith.cmpi sle, %17, %33 : vector<8x128xi32>
    %35 = arith.andi %32, %34 : vector<8x128xi1>
    %c1_i32_9 = arith.constant 1 : i32
    %36 = vector.broadcast %c1_i32_9 : i32 to vector<8x128xi32>
    %37 = arith.addi %17, %36 : vector<8x128xi32>
    %c3_i32 = arith.constant 3 : i32
    %38 = vector.broadcast %c3_i32 : i32 to vector<8x128xi32>
    %39 = arith.cmpi eq, %17, %38 : vector<8x128xi32>
    %c1_i32_10 = arith.constant 1 : i32
    %c-1_i32 = arith.constant -1 : i32
    %40 = vector.broadcast %c1_i32_10 : i32 to vector<8x128xi32>
    %41 = vector.broadcast %c-1_i32 : i32 to vector<8x128xi32>
    %42 = arith.select %39, %40, %41 : vector<8x128xi1>, vector<8x128xi32>
    %43 = arith.select %35, %37, %42 : vector<8x128xi1>, vector<8x128xi32>
    %c2_i32_11 = arith.constant 2 : i32
    %44 = vector.broadcast %c2_i32_11 : i32 to vector<8x128xi32>
    %45 = arith.cmpi sge, %17, %44 : vector<8x128xi32>
    %c3_i32_12 = arith.constant 3 : i32
    %46 = vector.broadcast %c3_i32_12 : i32 to vector<8x128xi32>
    %47 = arith.cmpi sle, %17, %46 : vector<8x128xi32>
    %48 = arith.andi %45, %47 : vector<8x128xi1>
    %c1_i32_13 = arith.constant 1 : i32
    %49 = vector.broadcast %c1_i32_13 : i32 to vector<8x128xi32>
    %50 = arith.subi %17, %49 : vector<8x128xi32>
    %c1_i32_14 = arith.constant 1 : i32
    %51 = vector.broadcast %c1_i32_14 : i32 to vector<8x128xi32>
    %52 = arith.cmpi eq, %17, %51 : vector<8x128xi32>
    %c3_i32_15 = arith.constant 3 : i32
    %c-1_i32_16 = arith.constant -1 : i32
    %53 = vector.broadcast %c3_i32_15 : i32 to vector<8x128xi32>
    %54 = vector.broadcast %c-1_i32_16 : i32 to vector<8x128xi32>
    %55 = arith.select %52, %53, %54 : vector<8x128xi1>, vector<8x128xi32>
    %56 = arith.select %48, %50, %55 : vector<8x128xi1>, vector<8x128xi32>
    %57 = vector.shape_cast %43 : vector<8x128xi32> to vector<1x8x128xi32>
    %58 = vector.broadcast %57 : vector<1x8x128xi32> to vector<4x8x128xi32>
    %59 = arith.cmpi eq, %25, %58 : vector<4x8x128xi32>
    %60 = arith.extui %59 : vector<4x8x128xi1> to vector<4x8x128xi32>
    %61 = arith.sitofp %60 : vector<4x8x128xi32> to vector<4x8x128xf32>
    %62 = vector.shape_cast %56 : vector<8x128xi32> to vector<1x8x128xi32>
    %63 = vector.broadcast %62 : vector<1x8x128xi32> to vector<4x8x128xi32>
    %64 = arith.cmpi eq, %25, %63 : vector<4x8x128xi32>
    %65 = arith.extui %64 : vector<4x8x128xi1> to vector<4x8x128xi32>
    %66 = arith.sitofp %65 : vector<4x8x128xi32> to vector<4x8x128xf32>
    %c0_17 = arith.constant 0 : index
    %c0_18 = arith.constant 0 : index
    %c0_19 = arith.constant 0 : index
    %c0_20 = arith.constant 0 : index
    %67 = vector.load %arg4[%c0_17, %c0_18, %c0_19, %c0_20] : memref<1x5x4x128xf32, #tpu.memory_space<vmem>>, vector<1x1x4x128xf32>
    %68 = vector.shape_cast %67 : vector<1x1x4x128xf32> to vector<4x128xf32>
    %69 = arith.mulf %24, %30 : vector<4x8x128xf32>
    %cst_21 = arith.constant dense<0.000000e+00> : vector<4x128xf32>
    %70 = vector.multi_reduction <add>, %69, %cst_21 [1] : vector<4x8x128xf32> to vector<4x128xf32>
    %71 = arith.addf %68, %70 : vector<4x128xf32>
    %c0_22 = arith.constant 0 : index
    %c0_23 = arith.constant 0 : index
    %c0_24 = arith.constant 0 : index
    %c0_25 = arith.constant 0 : index
    %72 = vector.load %arg4[%c0_22, %c0_23, %c0_24, %c0_25] : memref<1x5x4x128xf32, #tpu.memory_space<vmem>>, vector<1x1x4x128xf32>
    %73 = vector.shape_cast %72 : vector<1x1x4x128xf32> to vector<4x128xf32>
    %74 = vector.shape_cast %71 : vector<4x128xf32> to vector<1x1x4x128xf32>
    tpu.vector_store %arg4[%c0_22, %c0_23, %c0_24, %c0_25], %74 {strides = array<i32>} : memref<1x5x4x128xf32, #tpu.memory_space<vmem>>, vector<1x1x4x128xf32>,
    %c0_26 = arith.constant 0 : index
    %c1 = arith.constant 1 : index
    %c0_27 = arith.constant 0 : index
    %c0_28 = arith.constant 0 : index
    %75 = vector.load %arg4[%c0_26, %c1, %c0_27, %c0_28] : memref<1x5x4x128xf32, #tpu.memory_space<vmem>>, vector<1x1x4x128xf32>
    %76 = vector.shape_cast %75 : vector<1x1x4x128xf32> to vector<4x128xf32>
    %77 = arith.mulf %24, %61 : vector<4x8x128xf32>
    %cst_29 = arith.constant dense<0.000000e+00> : vector<4x128xf32>
    %78 = vector.multi_reduction <add>, %77, %cst_29 [1] : vector<4x8x128xf32> to vector<4x128xf32>
    %79 = arith.addf %76, %78 : vector<4x128xf32>
    %c0_30 = arith.constant 0 : index
    %c1_31 = arith.constant 1 : index
    %c0_32 = arith.constant 0 : index
    %c0_33 = arith.constant 0 : index
    %80 = vector.load %arg4[%c0_30, %c1_31, %c0_32, %c0_33] : memref<1x5x4x128xf32, #tpu.memory_space<vmem>>, vector<1x1x4x128xf32>
    %81 = vector.shape_cast %80 : vector<1x1x4x128xf32> to vector<4x128xf32>
    %82 = vector.shape_cast %79 : vector<4x128xf32> to vector<1x1x4x128xf32>
    tpu.vector_store %arg4[%c0_30, %c1_31, %c0_32, %c0_33], %82 {strides = array<i32>} : memref<1x5x4x128xf32, #tpu.memory_space<vmem>>, vector<1x1x4x128xf32>,
    %c0_34 = arith.constant 0 : index
    %c2 = arith.constant 2 : index
    %c0_35 = arith.constant 0 : index
    %c0_36 = arith.constant 0 : index
    %83 = vector.load %arg4[%c0_34, %c2, %c0_35, %c0_36] : memref<1x5x4x128xf32, #tpu.memory_space<vmem>>, vector<1x1x4x128xf32>
    %84 = vector.shape_cast %83 : vector<1x1x4x128xf32> to vector<4x128xf32>
    %85 = arith.mulf %24, %66 : vector<4x8x128xf32>
    %cst_37 = arith.constant dense<0.000000e+00> : vector<4x128xf32>
    %86 = vector.multi_reduction <add>, %85, %cst_37 [1] : vector<4x8x128xf32> to vector<4x128xf32>
    %87 = arith.addf %84, %86 : vector<4x128xf32>
    %c0_38 = arith.constant 0 : index
    %c2_39 = arith.constant 2 : index
    %c0_40 = arith.constant 0 : index
    %c0_41 = arith.constant 0 : index
    %88 = vector.load %arg4[%c0_38, %c2_39, %c0_40, %c0_41] : memref<1x5x4x128xf32, #tpu.memory_space<vmem>>, vector<1x1x4x128xf32>
    %89 = vector.shape_cast %88 : vector<1x1x4x128xf32> to vector<4x128xf32>
    %90 = vector.shape_cast %87 : vector<4x128xf32> to vector<1x1x4x128xf32>
    tpu.vector_store %arg4[%c0_38, %c2_39, %c0_40, %c0_41], %90 {strides = array<i32>} : memref<1x5x4x128xf32, #tpu.memory_space<vmem>>, vector<1x1x4x128xf32>,
    %c0_42 = arith.constant 0 : index
    %c3 = arith.constant 3 : index
    %c0_43 = arith.constant 0 : index
    %c0_44 = arith.constant 0 : index
    %91 = vector.load %arg4[%c0_42, %c3, %c0_43, %c0_44] : memref<1x5x4x128xf32, #tpu.memory_space<vmem>>, vector<1x1x4x128xf32>
    %92 = vector.shape_cast %91 : vector<1x1x4x128xf32> to vector<4x128xf32>
    %cst_45 = arith.constant dense<0.000000e+00> : vector<4x128xf32>
    %93 = vector.multi_reduction <add>, %24, %cst_45 [1] : vector<4x8x128xf32> to vector<4x128xf32>
    %94 = arith.addf %92, %93 : vector<4x128xf32>
    %c0_46 = arith.constant 0 : index
    %c3_47 = arith.constant 3 : index
    %c0_48 = arith.constant 0 : index
    %c0_49 = arith.constant 0 : index
    %95 = vector.load %arg4[%c0_46, %c3_47, %c0_48, %c0_49] : memref<1x5x4x128xf32, #tpu.memory_space<vmem>>, vector<1x1x4x128xf32>
    %96 = vector.shape_cast %95 : vector<1x1x4x128xf32> to vector<4x128xf32>
    %97 = vector.shape_cast %94 : vector<4x128xf32> to vector<1x1x4x128xf32>
    tpu.vector_store %arg4[%c0_46, %c3_47, %c0_48, %c0_49], %97 {strides = array<i32>} : memref<1x5x4x128xf32, #tpu.memory_space<vmem>>, vector<1x1x4x128xf32>,
    %c0_50 = arith.constant 0 : index
    %c4 = arith.constant 4 : index
    %c0_51 = arith.constant 0 : index
    %c0_52 = arith.constant 0 : index
    %98 = vector.load %arg4[%c0_50, %c4, %c0_51, %c0_52] : memref<1x5x4x128xf32, #tpu.memory_space<vmem>>, vector<1x1x4x128xf32>
    %99 = vector.shape_cast %98 : vector<1x1x4x128xf32> to vector<4x128xf32>
    %cst_53 = arith.constant dense<0.000000e+00> : vector<4x128xf32>
    %100 = vector.multi_reduction <add>, %30, %cst_53 [1] : vector<4x8x128xf32> to vector<4x128xf32>
    %101 = arith.addf %99, %100 : vector<4x128xf32>
    %c0_54 = arith.constant 0 : index
    %c4_55 = arith.constant 4 : index
    %c0_56 = arith.constant 0 : index
    %c0_57 = arith.constant 0 : index
    %102 = vector.load %arg4[%c0_54, %c4_55, %c0_56, %c0_57] : memref<1x5x4x128xf32, #tpu.memory_space<vmem>>, vector<1x1x4x128xf32>
    %103 = vector.shape_cast %102 : vector<1x1x4x128xf32> to vector<4x128xf32>
    %104 = vector.shape_cast %101 : vector<4x128xf32> to vector<1x1x4x128xf32>
    tpu.vector_store %arg4[%c0_54, %c4_55, %c0_56, %c0_57], %104 {strides = array<i32>} : memref<1x5x4x128xf32, #tpu.memory_space<vmem>>, vector<1x1x4x128xf32>,
    return
  }
  func.func @transform_0(%arg0: i32, %arg1: i32) -> (i32, i32, i32, i32) {
    %c0_i32 = arith.constant 0 : i32
    %c0_i32_0 = arith.constant 0 : i32
    %c0_i32_1 = arith.constant 0 : i32
    return %arg0, %c0_i32, %arg1, %c0_i32_0 : i32, i32, i32, i32
  }
  func.func @transform_1(%arg0: i32, %arg1: i32) -> (i32, i32, i32) {
    %c0_i32 = arith.constant 0 : i32
    %c0_i32_0 = arith.constant 0 : i32
    return %arg0, %arg1, %c0_i32 : i32, i32, i32
  }
  func.func @transform_2(%arg0: i32, %arg1: i32) -> (i32, i32, i32, i32) {
    %c0_i32 = arith.constant 0 : i32
    %c0_i32_0 = arith.constant 0 : i32
    %c0_i32_1 = arith.constant 0 : i32
    %c0_i32_2 = arith.constant 0 : i32
    return %arg0, %c0_i32, %c0_i32_0, %c0_i32_1 : i32, i32, i32, i32
  }
}

</mosaic_0001>

<bundles_post_ra>
// kernel: weight_multiclass_dice_loss.1
= control target key start
LH: loop header
LB: loop body
LE: loop exit
PB: predicated region body
PF: predicated region fallthrough
CT: control target
= control target key end

     0   :  { %s691_s9 = smov 0   ;;  %s693_s10 = smov 0   ;;  %s898_s0 = inlined_call_operand.vmem [shape: f32[2,4,8,128], index: 0, kind: input, shape index: {}]   ;;  %s899_s1 = inlined_call_operand.vmem [shape: s32[2,8,128], index: 1, kind: input, shape index: {}]   ;;  %s900_s2 = inlined_call_operand.vmem [shape: f32[2,5,4,128], index: 2, kind: output, shape index: {}]  }
   0x1   :  { %s695_s11 = smov 0  }
   0x2 LB: > { %s24_s12 = sadd.s32 1, %s668_s10  ;;  %p583_p0 = scmp.ge.s32.totalorder %s672_s11, 1  ;;  %s672_s11 = sphi %s695_s11, %s12_s11   ;;  %s668_s10 = sphi %s693_s10, %s904_s10   ;;  %s664_s9 = sphi %s691_s9, %s903_s9  }
   0x3   : > { %p26_p1 = scmp.ge.s32.totalorder %s24_s12, 2  ;;  %p143_p2 = scmp.lt.s32.totalorder %s672_s11, 3 }
   0x5   : > { %s906_s12 = smov (%p26_p1, %s24_s12), 0  ;;  %p144_p3 = pnand %p583_p0, %p143_p2 }
   0x6   : > { %p175_p4 = scmp.lt.s32.totalorder (!%p144_p3), %s664_s9, 1 }
   0x7   : > { %147 = sbr.rel (%p144_p3) target bundleno = 97 (0x61), region = 28 }
   0xc   : > { %s908_s9 = smov (!%p175_p4, %s664_s9), 1  ;;  %v674_v3 = vmov 0.0   ;;  %v675_v24 = vmov 4294967295  }
   0xd   : > { %s613_s13 = smul.u32 20, %s908_s9  ;;  %s612_s14 = sshll.u32 %s908_s9, 5 }
   0xe   : > { %s182_s17 = scalar_lea.vmem %s898_s0, %s612_s14  ;;  %s586_s21 = sshll.u32 %s908_s9, 3 }
   0xf   : > { %s719_s20 = scalar_lea.vmem %s900_s2, %s613_s13  ;;  %v204_v0 = vld [vmem:[%s182_s17] sm:$0xff]  ;;  %v205_v1 = vld [vmem:[%s182_s17 + $0x8] sm:$0xff]  ;;  %v206_v2 = vld [vmem:[%s182_s17 + $0x10] sm:$0xff]  ;;  %s189_s24 = scalar_lea.vmem %s899_s1, %s586_s21 }
  0x10   : > { %199 = vst [vmem:[%s719_s20] sm:$0xf] %v674_v3  ;;  %v207_v4 = vld [vmem:[%s182_s17 + $0x18] sm:$0xff]  ;;  %v208_v5 = vmax.f32 %v204_v0, %v205_v1  ;;  %v245_v16 = vld [vmem:[%s189_s24] sm:$0xff] }
  0x11   : > { %200 = vst [vmem:[%s719_s20 + $0x4] sm:$0xf] %v674_v3  ;;  %v209_v6 = vmax.f32 %v206_v2, %v207_v4  ;;  %vm256_vm0 = vcmp.eq.s32.totalorder %v245_v16, 3  ;;  %vm265_vm1 = vcmp.ge.s32.totalorder %v245_v16, 1  ;;  %vm266_vm2 = vcmp.le.s32.totalorder %v245_v16, 2 }
  0x12   : > { %201 = vst [vmem:[%s719_s20 + $0x8] sm:$0xf] %v674_v3  ;;  %v268_v23 = vadd.s32 1, %v245_v16  ;;  %v269_v25 = vsel %vm256_vm0, 1, %v675_v24  ;;  %vm267_vm3 = vmand %vm265_vm1, %vm266_vm2  ;;  %vm254_vm4 = vcmp.eq.s32.totalorder %v245_v16, 1  ;;  %vm271_vm5 = vcmp.ge.s32.totalorder %v245_v16, 2 }
  0x13   : > { %202 = vst [vmem:[%s719_s20 + $0xc] sm:$0xf] %v674_v3  ;;  %v210_v7 = vmax.f32 %v208_v5, %v209_v6  ;;  %vm272_vm6 = vcmp.le.s32.totalorder %v245_v16, 3  ;;  %v593_v28 = vadd.s32 4294967295, %v245_v16  ;;  %v275_v29 = vsel %vm254_vm4, 3, %v675_v24 }
  0x14   : > { %203 = vst [vmem:[%s719_s20 + $0x10] sm:$0xf] %v674_v3  ;;  %v270_v27 = vsel %vm267_vm3, %v268_v23, %v269_v25  ;;  %vm273_vm7 = vmand %vm271_vm5, %vm272_vm6  ;;  %vm246_vm8 = vcmp.lt.s32.totalorder %v245_v16, 4  ;;  %vm253_vm9 = vcmp.eq.s32.totalorder %v245_v16, 0  ;;  %vm255_vm10 = vcmp.eq.s32.totalorder %v245_v16, 2 }
  0x15   : > { %v211_v8 = vsub.f32 %v204_v0, %v210_v7  ;;  %v212_v9 = vsub.f32 %v205_v1, %v210_v7  ;;  %v213_v10 = vsub.f32 %v206_v2, %v210_v7  ;;  %v214_v11 = vsub.f32 %v207_v4, %v210_v7 }
  0x16   : > { %vm277_vm11 = vcmp.eq.s32.totalorder %v270_v27, 0  ;;  %vm278_vm12 = vcmp.eq.s32.totalorder %v270_v27, 1  ;;  %vm279_vm13 = vcmp.eq.s32.totalorder %v270_v27, 2  ;;  %vm280_vm14 = vcmp.eq.s32.totalorder %v270_v27, 3 }
  0x17   : > { %v215_v12 = vmul.f32 1.442695, %v211_v8  ;;  %v217_v13 = vmul.f32 1.442695, %v212_v9  ;;  %v219_v14 = vmul.f32 1.442695, %v213_v10  ;;  %v749_v30 = vsel %vm273_vm7, %v593_v28, %v275_v29 }
  0x18   : > { %v221_v15 = vmul.f32 1.442695, %v214_v11  ;;  %v588_v31 = vsel %vm246_vm8, 1.0, %v674_v3  ;;  %v753_v32 = vsel %vm253_vm9, 1.0, %v674_v3  ;;  %v757_v33 = vsel %vm254_vm4, 1.0, %v674_v3 }
  0x19   : > { %640 = vpow2.f32 %v215_v12  ;;  %v760_v35 = vsel %vm255_vm10, 1.0, %v674_v3  ;;  %v764_v36 = vsel %vm256_vm0, 1.0, %v674_v3  ;;  %v767_v37 = vsel %vm277_vm11, 1.0, %v674_v3 }
  0x1a   : > { %642 = vpow2.f32 %v217_v13  ;;  %v770_v38 = vsel %vm278_vm12, 1.0, %v674_v3  ;;  %v596_v40 = vsel %vm279_vm13, 1.0, %v674_v3  ;;  %v597_v41 = vsel %vm280_vm14, 1.0, %v674_v3 }
  0x1b   : > { %644 = vpow2.f32 %v219_v14  ;;  %vm289_vm15 = vcmp.eq.s32.totalorder %v749_v30, 0  ;;  %v461_v43 = vrot.slane %v753_v32, 4  ;;  %v467_v44 = vrot.slane %v757_v33, 4 }
  0x1c   : > { %646 = vpow2.f32 %v221_v15  ;;  %v473_v47 = vrot.slane %v760_v35, 4  ;;  %vm290_vm2 = vcmp.eq.s32.totalorder %v749_v30, 1  ;;  %v479_v50 = vrot.slane %v764_v36, 4 }
  0x1d   : > { %v462_v48 = vadd.f32 %v753_v32, %v461_v43  ;;  %v468_v49 = vadd.f32 %v757_v33, %v467_v44  ;;  %vm291_vm3 = vcmp.eq.s32.totalorder %v749_v30, 2  ;;  %vm292_vm4 = vcmp.eq.s32.totalorder %v749_v30, 3 }
  0x1e   : > { %v474_v52 = vadd.f32 %v760_v35, %v473_v47  ;;  %v480_v57 = vadd.f32 %v764_v36, %v479_v50  ;;  %v794_v59 = vsel %vm289_vm15, 1.0, %v674_v3  ;;  %v799_v61 = vsel %vm290_vm2, 1.0, %v674_v3 }
  0x1f   : > { %v735_v17 = vpop.eup %640  ;;  %v463_v55 = vrot.slane %v462_v48, 2  ;;  %v469_v56 = vrot.slane %v468_v49, 2  ;;  %vm334_vm7 = vcmask 1041409   ;;  %v806_v2 = vsel %vm291_vm3, 1.0, %v674_v3 }
  0x20   : > { %v737_v18 = vpop.eup %642  ;;  %v475_v60 = vrot.slane %v474_v52, 2  ;;  %v481_v0 = vrot.slane %v480_v57, 2  ;;  %vm336_vm8 = vcmask 1042434   ;;  %vm338_vm9 = vcmask 1043459  }
  0x21   : > { %v739_v19 = vpop.eup %644  ;;  %v223_v20 = vadd.f32 %v737_v18, %v735_v17  ;;  %v464_v62 = vadd.f32 %v463_v55, %v462_v48  ;;  %v470_v63 = vadd.f32 %v469_v56, %v468_v49 }
  0x22   : > { %v743_v21 = vpop.eup %646  ;;  %v476_v4 = vadd.f32 %v475_v60, %v474_v52  ;;  %v482_v8 = vadd.f32 %v481_v0, %v480_v57 }
  0x23   : > { %v224_v22 = vadd.f32 %v739_v19, %v223_v20  ;;  %v465_v6 = vrot.slane %v464_v62, 1  ;;  %v471_v7 = vrot.slane %v470_v63, 1 }
  0x24   : > { %v477_v15 = vrot.slane %v476_v4, 1  ;;  %v483_v16 = vrot.slane %v482_v8, 1 }
  0x25   : > { %v225_v26 = vadd.f32 %v743_v21, %v224_v22  ;;  %v466_v13 = vadd.f32 %v465_v6, %v464_v62  ;;  %v472_v14 = vadd.f32 %v471_v7, %v470_v63 }
  0x27   : > { %648 = vrcp.f32 %v225_v26  ;;  %vm231_vm1 = vweird.f32 %v225_v26  ;;  %v237_v42 = vand.u32 2147483648, %v225_v26  ;;  %v235_v46 = vand.u32 2147483647, %v225_v26 }
  0x29   : > { %v238_v54 = vor.u32 1.1754944e-38, %v237_v42  ;;  %vm236_vm6 = vcmp.eq.f32.partialorder %v235_v46, 8.507059e+37 }
  0x2d   : > { %v649_v34 = vpop.eup %648 }
  0x2e   : > { %v227_v39 = vmul.f32 %v649_v34, %v225_v26  ;;  %vm232_vm0 = vweird.f32 %v649_v34 }
  0x2f   : > { %vm786_vm5 = vmor %vm231_vm1, %vm232_vm0 }
  0x30   : > { %v228_v45 = vsub.f32 1.0, %v227_v39 }
  0x32   : > { %v229_v51 = vmul.f32 %v649_v34, %v228_v45 }
  0x34   : > { %v230_v58 = vadd.f32 %v649_v34, %v229_v51 }
  0x36   : > { %v234_v1 = vsel %vm786_vm5, %v649_v34, %v230_v58 }
  0x37   : > { %v239_v5 = vsel %vm236_vm6, %v238_v54, %v234_v1 }
  0x38   : > { %v241_v9 = vmul.f32 %v735_v17, %v239_v5  ;;  %v242_v10 = vmul.f32 %v737_v18, %v239_v5  ;;  %v243_v11 = vmul.f32 %v739_v19, %v239_v5  ;;  %v244_v12 = vmul.f32 %v743_v21, %v239_v5 }
  0x39   : > { %v823_v17 = vsel %vm292_vm4, 1.0, %v674_v3  ;;  %v825_v18 = vadd.f32 %v477_v15, %v476_v4  ;;  %v827_v19 = vadd.f32 %v483_v16, %v482_v8  ;;  %v830_v21 = vsel %vm334_vm7, %v472_v14, %v466_v13 }
  0x3a   : > { %v812_v20 = vmul.f32 %v588_v31, %v241_v9  ;;  %v814_v22 = vmul.f32 %v588_v31, %v242_v10  ;;  %v816_v23 = vmul.f32 %v588_v31, %v243_v11  ;;  %v818_v24 = vmul.f32 %v588_v31, %v244_v12 }
  0x3c   : > { %v302_v25 = vmul.f32 %v753_v32, %v812_v20  ;;  %v303_v26 = vmul.f32 %v757_v33, %v814_v22  ;;  %v304_v27 = vmul.f32 %v760_v35, %v816_v23  ;;  %v305_v3 = vmul.f32 %v764_v36, %v818_v24 }
  0x3d   : > { %v345_v28 = vmul.f32 %v767_v37, %v812_v20  ;;  %v346_v29 = vmul.f32 %v770_v38, %v814_v22  ;;  %v347_v30 = vmul.f32 %v596_v40, %v816_v23  ;;  %v348_v31 = vmul.f32 %v597_v41, %v818_v24 }
  0x3e   : > { %v306_v32 = vrot.slane %v302_v25, 4  ;;  %v312_v34 = vrot.slane %v303_v26, 4  ;;  %v318_v39 = vrot.slane %v304_v27, 4  ;;  %v324_v33 = vrot.slane %v305_v3, 4 }
  0x3f   : > { %v349_v42 = vrot.slane %v345_v28, 4  ;;  %v355_v43 = vrot.slane %v346_v29, 4  ;;  %v361_v35 = vrot.slane %v347_v30, 4  ;;  %v367_v44 = vrot.slane %v348_v31, 4 }
  0x40   : > { %v307_v45 = vadd.f32 %v306_v32, %v302_v25  ;;  %v313_v36 = vadd.f32 %v312_v34, %v303_v26  ;;  %v319_v46 = vadd.f32 %v318_v39, %v304_v27  ;;  %v325_v47 = vadd.f32 %v324_v33, %v305_v3  ;;  %v301_v3 = vld [vmem:[%s719_s20] sm:$0xf]  ;;  %v602_v34 = vld [vmem:[%s719_s20 + $0x4] sm:$0xf] }
  0x41   : > { %v350_v37 = vadd.f32 %v349_v42, %v345_v28  ;;  %v356_v38 = vadd.f32 %v355_v43, %v346_v29  ;;  %v362_v48 = vadd.f32 %v361_v35, %v347_v30  ;;  %v368_v40 = vadd.f32 %v367_v44, %v348_v31 }
  0x42   : > { %v308_v49 = vrot.slane %v307_v45, 2  ;;  %v314_v41 = vrot.slane %v313_v36, 2  ;;  %v320_v50 = vrot.slane %v319_v46, 2  ;;  %v326_v51 = vrot.slane %v325_v47, 2 }
  0x43   : > { %v351_v52 = vrot.slane %v350_v37, 2  ;;  %v357_v53 = vrot.slane %v356_v38, 2  ;;  %v363_v54 = vrot.slane %v362_v48, 2  ;;  %v369_v55 = vrot.slane %v368_v40, 2 }
  0x44   : > { %v309_v56 = vadd.f32 %v308_v49, %v307_v45  ;;  %v315_v57 = vadd.f32 %v314_v41, %v313_v36  ;;  %v321_v58 = vadd.f32 %v320_v50, %v319_v46  ;;  %v327_v60 = vadd.f32 %v326_v51, %v325_v47 }
  0x45   : > { %v352_v62 = vadd.f32 %v351_v52, %v350_v37  ;;  %v358_v63 = vadd.f32 %v357_v53, %v356_v38  ;;  %v364_v0 = vadd.f32 %v363_v54, %v362_v48  ;;  %v370_v1 = vadd.f32 %v369_v55, %v368_v40 }
  0x46   : > { %v310_v4 = vrot.slane %v309_v56, 1  ;;  %v316_v5 = vrot.slane %v315_v57, 1  ;;  %v322_v6 = vrot.slane %v321_v58, 1  ;;  %v328_v7 = vrot.slane %v327_v60, 1 }
  0x47   : > { %v353_v8 = vrot.slane %v352_v62, 1  ;;  %v359_v9 = vrot.slane %v358_v63, 1  ;;  %v365_v10 = vrot.slane %v364_v0, 1  ;;  %v371_v11 = vrot.slane %v370_v1, 1 }
  0x48   : > { %v311_v12 = vadd.f32 %v310_v4, %v309_v56  ;;  %v317_v13 = vadd.f32 %v316_v5, %v315_v57  ;;  %v323_v14 = vadd.f32 %v322_v6, %v321_v58  ;;  %v329_v15 = vadd.f32 %v328_v7, %v327_v60 }
  0x49   : > { %v354_v16 = vadd.f32 %v353_v8, %v352_v62  ;;  %v360_v25 = vadd.f32 %v359_v9, %v358_v63  ;;  %v366_v26 = vadd.f32 %v365_v10, %v364_v0  ;;  %v372_v27 = vadd.f32 %v371_v11, %v370_v1 }
  0x4a   : > { %v335_v28 = vsel %vm334_vm7, %v317_v13, %v311_v12  ;;  %v385_v29 = vmul.f32 %v794_v59, %v812_v20  ;;  %v386_v30 = vmul.f32 %v799_v61, %v814_v22  ;;  %v387_v31 = vmul.f32 %v806_v2, %v816_v23 }
  0x4b   : > { %v337_v32 = vsel %vm336_vm8, %v323_v14, %v335_v28  ;;  %v377_v39 = vsel %vm334_vm7, %v360_v25, %v354_v16  ;;  %v388_v33 = vmul.f32 %v823_v17, %v818_v24  ;;  %v425_v42 = vrot.slane %v812_v20, 4  ;;  %v608_v25 = vld [vmem:[%s719_s20 + $0x10] sm:$0xf] }
  0x4c   : > { %v339_v43 = vsel %vm338_vm9, %v329_v15, %v337_v32  ;;  %v378_v59 = vsel %vm336_vm8, %v366_v26, %v377_v39  ;;  %v389_v61 = vrot.slane %v385_v29, 4  ;;  %v395_v35 = vrot.slane %v386_v30, 4  ;;  %v604_v26 = vld [vmem:[%s719_s20 + $0x8] sm:$0xf] }
  0x4d   : > { %v341_v44 = vadd.f32 %v339_v43, %v301_v3  ;;  %v379_v2 = vsel %vm338_vm9, %v372_v27, %v378_v59  ;;  %v401_v45 = vrot.slane %v387_v31, 4  ;;  %v407_v36 = vrot.slane %v388_v33, 4  ;;  %v606_v43 = vld [vmem:[%s719_s20 + $0xc] sm:$0xf] }
  0x4e   : > { %v381_v46 = vadd.f32 %v602_v34, %v379_v2  ;;  %v390_v47 = vadd.f32 %v389_v61, %v385_v29  ;;  %v396_v37 = vadd.f32 %v395_v35, %v386_v30  ;;  %v426_v38 = vadd.f32 %v425_v42, %v812_v20 }
  0x4f   : > { %342 = vst [vmem:[%s719_s20] sm:$0xf] %v341_v44  ;;  %v402_v17 = vadd.f32 %v401_v45, %v387_v31  ;;  %v408_v48 = vadd.f32 %v407_v36, %v388_v33  ;;  %v431_v40 = vrot.slane %v814_v22, 4  ;;  %v437_v49 = vrot.slane %v816_v23, 4 }
  0x50   : > { %603 = vst [vmem:[%s719_s20 + $0x4] sm:$0xf] %v381_v46  ;;  %v391_v41 = vrot.slane %v390_v47, 2  ;;  %v397_v50 = vrot.slane %v396_v37, 2  ;;  %v427_v51 = vrot.slane %v426_v38, 2  ;;  %v443_v52 = vrot.slane %v818_v24, 4 }
  0x51   : > { %v403_v53 = vrot.slane %v402_v17, 2  ;;  %v409_v54 = vrot.slane %v408_v48, 2  ;;  %v432_v55 = vadd.f32 %v431_v40, %v814_v22  ;;  %v438_v56 = vadd.f32 %v437_v49, %v816_v23 }
  0x52   : > { %v392_v20 = vadd.f32 %v391_v41, %v390_v47  ;;  %v398_v57 = vadd.f32 %v397_v50, %v396_v37  ;;  %v428_v58 = vadd.f32 %v427_v51, %v426_v38  ;;  %v444_v60 = vadd.f32 %v443_v52, %v818_v24 }
  0x53   : > { %v404_v62 = vadd.f32 %v403_v53, %v402_v17  ;;  %v410_v63 = vadd.f32 %v409_v54, %v408_v48  ;;  %v433_v0 = vrot.slane %v432_v55, 2  ;;  %v439_v1 = vrot.slane %v438_v56, 2 }
  0x54   : > { %v393_v4 = vrot.slane %v392_v20, 1  ;;  %v399_v5 = vrot.slane %v398_v57, 1  ;;  %v429_v6 = vrot.slane %v428_v58, 1  ;;  %v445_v7 = vrot.slane %v444_v60, 2 }
  0x55   : > { %v405_v8 = vrot.slane %v404_v62, 1  ;;  %v411_v9 = vrot.slane %v410_v63, 1  ;;  %v434_v22 = vadd.f32 %v433_v0, %v432_v55  ;;  %v440_v10 = vadd.f32 %v439_v1, %v438_v56 }
  0x56   : > { %v394_v23 = vadd.f32 %v393_v4, %v392_v20  ;;  %v400_v11 = vadd.f32 %v399_v5, %v398_v57  ;;  %v430_v12 = vadd.f32 %v429_v6, %v428_v58  ;;  %v446_v13 = vadd.f32 %v445_v7, %v444_v60 }
  0x57   : > { %v406_v14 = vadd.f32 %v405_v8, %v404_v62  ;;  %v412_v24 = vadd.f32 %v411_v9, %v410_v63  ;;  %v435_v15 = vrot.slane %v434_v22, 1  ;;  %v441_v16 = vrot.slane %v440_v10, 1 }
  0x58   : > { %v417_v27 = vsel %vm334_vm7, %v400_v11, %v394_v23  ;;  %v447_v3 = vrot.slane %v446_v13, 1  ;;  %v490_v28 = vsel %vm336_vm8, %v825_v18, %v830_v21 }
  0x59   : > { %v418_v29 = vsel %vm336_vm8, %v406_v14, %v417_v27  ;;  %v436_v30 = vadd.f32 %v435_v15, %v434_v22  ;;  %v442_v31 = vadd.f32 %v441_v16, %v440_v10  ;;  %v491_v32 = vsel %vm338_vm9, %v827_v19, %v490_v28 }
  0x5a   : > { %v419_v34 = vsel %vm338_vm9, %v412_v24, %v418_v29  ;;  %v448_v39 = vadd.f32 %v447_v3, %v446_v13  ;;  %v493_v33 = vadd.f32 %v608_v25, %v491_v32 }
  0x5b   : > { %v421_v42 = vadd.f32 %v604_v26, %v419_v34  ;;  %v453_v59 = vsel %vm334_vm7, %v436_v30, %v430_v12 }
  0x5c   : > { %v454_v61 = vsel %vm336_vm8, %v442_v31, %v453_v59  ;;  %609 = vst [vmem:[%s719_s20 + $0x10] sm:$0xf] %v493_v33 }
  0x5d   : > { %605 = vst [vmem:[%s719_s20 + $0x8] sm:$0xf] %v421_v42  ;;  %v455_v18 = vsel %vm338_vm9, %v448_v39, %v454_v61 }
  0x5e   : > { %v457_v21 = vadd.f32 %v606_v43, %v455_v18 }
  0x60   : > { %607 = vst [vmem:[%s719_s20 + $0xc] sm:$0xf] %v457_v21 }
  0x61 PF: > { %s12_s11 = sadd.s32 1, %s672_s11   ;;  %s903_s9 = smov %s668_s10 }
  0x62   : > { %p9_p5 = scmp.ge.s32.totalorder %s12_s11, 4   ;;  %s904_s10 = smov %s906_s12 }
  0x64   :  { %11 = sbr.rel (!%p9_p5) target bundleno = 2 (0x2), region = 69 }

</bundles_post_ra>
